<compile_context>
chip_gen: v7x
topology: tpu7x:2x2x1
jax: 0.10.0
libtpu: 0.0.40
codegen_flags: <defaults>
</compile_context>

<pallas_src>
import math
import jax
import jax.numpy as jnp
from jax import lax
from jax.experimental import pallas as pl
from jax.experimental.pallas import tpu as pltpu

# --- problem sizes (small, consistent with the module) ---
BATCH = 2
SEQ = 16             # N
MODEL_DIM = 32       # D
N_HEADS = 2          # H
DEPTH = MODEL_DIM // N_HEADS
MLP_DIM = 64
EPS = 1e-6

BN = BATCH * SEQ                 # folded row count
VEC_LANES = 128
PROJ = 4 * MODEL_DIM             # q | k | v | head-expanded logits = 128 lanes

# --- packed parameter slab layout (rows of a (SLAB_ROWS, 128) f32 array) ---
R0_WPROJ = 0                          # (D, 128)       wq | wk | wv | (wq@wqa*scale)@E
R0_WOW1 = R0_WPROJ + MODEL_DIM        # (D, 128)       wo | w1 | pad
R0_W2 = R0_WOW1 + MODEL_DIM           # (MLP_DIM, 128) w2 | pad
R0_VEC = R0_W2 + MLP_DIM              # (8, 128)       bias / LayerNorm vectors
R0_P = R0_VEC + 8                     # (BN, 128)      block-diagonal segment matrix | pad
SLAB_ROWS = R0_P + BN                 # 168

# rows of the (8, 128) vector block
(R_LN1_G, R_LN1_B, R_BPROJ, R_BO, R_LN2_G, R_LN2_B, R_B1, R_B2) = range(8)


def _layernorm(x, gamma, beta, eps):
    mu = jnp.mean(x, axis=-1, keepdims=True)
    var = jnp.mean((x - mu) ** 2, axis=-1, keepdims=True)
    return (x - mu) * lax.rsqrt(var + eps) * gamma + beta


def ladaformer_kernel(x_ref, slab_ref, out_ref):
    f32 = jnp.float32
    N, D = SEQ, MODEL_DIM

    x = x_ref[...]                                           # (BN, D)

    # static, 8-aligned slices of the single packed parameter slab
    wproj = slab_ref[R0_WPROJ:R0_WPROJ + D, :]               # (D, 128)
    wow1 = slab_ref[R0_WOW1:R0_WOW1 + D, :]                  # (D, 128)  wo | w1 | pad
    w2 = slab_ref[R0_W2:R0_W2 + MLP_DIM, :D]                 # (MLP_DIM, D)
    V = slab_ref[R0_VEC:R0_VEC + 8, :]                       # (8, 128)
    P = slab_ref[R0_P:R0_P + BN, :BN]                        # (BN, BN) block-diag ones

    ln1_g = V[R_LN1_G:R_LN1_G + 1, :D]
    ln1_b = V[R_LN1_B:R_LN1_B + 1, :D]
    b_proj = V[R_BPROJ:R_BPROJ + 1, :]                       # (1, 128), full width
    bo = V[R_BO:R_BO + 1, :D]
    ln2_g = V[R_LN2_G:R_LN2_G + 1, :D]
    ln2_b = V[R_LN2_B:R_LN2_B + 1, :D]
    b1 = V[R_B1:R_B1 + 1, :MLP_DIM]
    b2 = V[R_B2:R_B2 + 1, :D]

    # ---- norm1 ----
    xn1 = _layernorm(x, ln1_g, ln1_b, EPS)

    # ---- fused q | k | v | head-expanded-logit projection (one 128-lane MXU matmul) ----
    proj = jnp.dot(xn1, wproj, preferred_element_type=f32) + b_proj   # (BN, 128)
    q = proj[:, 0:D]
    k = proj[:, D:2 * D]
    v = proj[:, 2 * D:3 * D]
    logits = proj[:, 3 * D:4 * D]            # (BN, D): col d = logit of head d//DEPTH, pre-scaled

    # ---- per-segment (per batch element) stable softmax over the sequence axis ----
    seg_max = []
    for b in range(BATCH):                                   # static unroll, 8-aligned slices
        m_b = jnp.max(logits[b * N:(b + 1) * N, :], axis=0, keepdims=True)   # (1, D)
        seg_max.append(jnp.broadcast_to(m_b, (N, D)))
    m_exp = jnp.concatenate(seg_max, axis=0)                 # (BN, D)
    e = jnp.exp(logits - m_exp)                              # (BN, D)

    # ---- fused segment matmul: [denom | gq_unnorm] = P @ [e | e*q] (one MXU matmul) ----
    seg = jnp.dot(P, jnp.concatenate([e, e * q], axis=1),
                  preferred_element_type=f32)                # (BN, 2D)
    denom = seg[:, 0:D]                                      # per-batch softmax sums, broadcast
    attn_exp = e / denom                                     # (BN, D) head-expanded attn weights
    gq = seg[:, D:2 * D] / denom                             # (BN, D) per-batch global query
    r = gq * k * v                                           # (BN, D)

    wo = wow1[:, 0:D]
    w1 = wow1[:, D:D + MLP_DIM]

    attn_out = x + jnp.dot(r, wo, preferred_element_type=f32) + bo     # residual 1 (dropout = 0)

    # ---- norm2 + MLP ----
    xn2 = _layernorm(attn_out, ln2_g, ln2_b, EPS)
    h1 = jnp.dot(xn2, w1, preferred_element_type=f32) + b1
    h1 = 0.5 * h1 * (1.0 + lax.erf(h1 * (1.0 / math.sqrt(2.0))))        # exact GELU (torch default)
    mlp = jnp.dot(h1, w2, preferred_element_type=f32) + b2
    y = mlp + attn_out                                                  # residual 2 (dropout = 0)

    # ---- single lane-dense 128-wide store: y | attn_exp | zeros ----
    out_ref[...] = jnp.concatenate(
        [y, attn_exp, jnp.zeros((BN, VEC_LANES - 2 * D), f32)], axis=1)


def pack_params(params):
    """Fold q_attn + head expansion into the projection and pack everything into one slab.

    Called ONCE (hoisted out of the per-call path).
    """
    f32 = jnp.float32
    scale = 1.0 / math.sqrt(DEPTH)
    hi = lax.Precision.HIGHEST

    # logits = (xn1 @ wq + bq) @ wqa + bqa == xn1 @ (wq @ wqa) + (bq @ wqa + bqa)
    wqa_eff = (jnp.dot(params["wq"], params["wqa"], precision=hi) * scale).astype(f32)    # (D, H)
    bqa_eff = ((jnp.dot(params["bq"], params["wqa"], precision=hi)
                + params["bqa"]) * scale).astype(f32)                                     # (1, H)
    # fold head-expansion E: column d of the expanded logits = logit of head d // DEPTH
    wqa_exp = jnp.repeat(wqa_eff, DEPTH, axis=1)                                          # (D, D)
    bqa_exp = jnp.repeat(bqa_eff, DEPTH, axis=1)                                          # (1, D)

    w_proj = jnp.concatenate(
        [params["wq"], params["wk"], params["wv"], wqa_exp], axis=1).astype(f32)          # (D, 128)
    b_proj = jnp.concatenate(
        [params["bq"], params["bk"], params["bv"], bqa_exp], axis=1).astype(f32)          # (1, 128)

    def pad_lanes(a):
        a = a.astype(f32)
        return jnp.pad(a, ((0, 0), (0, VEC_LANES - a.shape[1])))

    w_ow1 = pad_lanes(jnp.concatenate([params["wo"], params["w1"]], axis=1))              # (D, 128)
    w2_p = pad_lanes(params["w2"])                                                        # (MLP, 128)

    def row(a):
        return pad_lanes(a.reshape(1, -1))

    vec_pack = jnp.concatenate([
        row(params["ln1_g"]), row(params["ln1_b"]), row(b_proj), row(params["bo"]),
        row(params["ln2_g"]), row(params["ln2_b"]), row(params["b1"]), row(params["b2"]),
    ], axis=0)                                                                            # (8, 128)

    # block-diagonal segment matrix: P[i, j] = 1 iff rows i, j belong to the same batch
    seg_id = jnp.arange(BN) // SEQ
    P = (seg_id[:, None] == seg_id[None, :]).astype(f32)                                  # (BN, BN)
    P_pack = pad_lanes(P)                                                                 # (BN, 128)

    slab = jnp.concatenate([w_proj, w_ow1, w2_p, vec_pack, P_pack], axis=0)               # (168, 128)
    assert slab.shape == (SLAB_ROWS, VEC_LANES)
    return slab.astype(f32)


@jax.jit
def ladaformer_pallas(x, slab):
    B, N, D = x.shape
    f32 = jnp.float32
    x2d = x.reshape(B * N, D).astype(f32)

    vmem = pl.BlockSpec(memory_space=pltpu.MemorySpace.VMEM)
    out = pl.pallas_call(
        ladaformer_kernel,
        out_shape=jax.ShapeDtypeStruct((B * N, VEC_LANES), f32),
        in_specs=[vmem, vmem],
        out_specs=vmem,
    )(x2d, slab)

    y = out[:, :D].reshape(B, N, D)
    attn_exp = out[:, D:2 * D].reshape(B, N, N_HEADS, DEPTH)[:, :, :, 0]   # (B, N, H)
    attn_maps = jnp.transpose(attn_exp, (0, 2, 1))                          # (B, H, N)
    return y, attn_maps


# ---------------- pure-JAX reference (for correctness check) ----------------
def ladaformer_ref(x, p):
    def ln(z, g, b):
        mu = jnp.mean(z, axis=-1, keepdims=True)
        var = jnp.mean((z - mu) ** 2, axis=-1, keepdims=True)
        return (z - mu) / jnp.sqrt(var + EPS) * g + b

    B, N, D = x.shape
    xn1 = ln(x, p["ln1_g"], p["ln1_b"])
    q = xn1 @ p["wq"] + p["bq"]
    k = xn1 @ p["wk"] + p["bk"]
    v = xn1 @ p["wv"] + p["bv"]
    logits = (q @ p["wqa"] + p["bqa"]).transpose(0, 2, 1) / math.sqrt(DEPTH)   # (B, H, N)
    attn = jax.nn.softmax(logits, axis=-1)

    def split(z):
        return z.reshape(B, N, N_HEADS, DEPTH).transpose(0, 2, 1, 3)

    qs, ks, vs = split(q), split(k), split(v)
    gq = jnp.einsum("bhn,bhnd->bhd", attn, qs)[:, :, None, :]
    r = (gq * ks * vs).transpose(0, 2, 1, 3).reshape(B, N, D)
    out = r @ p["wo"] + p["bo"]
    attn_out = x + out
    xn2 = ln(attn_out, p["ln2_g"], p["ln2_b"])
    h1 = xn2 @ p["w1"] + p["b1"]
    h1 = 0.5 * h1 * (1.0 + lax.erf(h1 / math.sqrt(2.0)))
    mlp = h1 @ p["w2"] + p["b2"]
    return mlp + attn_out, attn


def init_params(key):
    ks = jax.random.split(key, 12)
    s = 0.05
    f32 = jnp.float32

    def rnd(k, shape):
        return (s * jax.random.normal(k, shape)).astype(f32)

    return {
        "ln1_g": jnp.ones((1, MODEL_DIM), f32),
        "ln1_b": jnp.zeros((1, MODEL_DIM), f32),
        "wq": rnd(ks[0], (MODEL_DIM, MODEL_DIM)),
        "bq": rnd(ks[1], (1, MODEL_DIM)),
        "wk": rnd(ks[2], (MODEL_DIM, MODEL_DIM)),
        "bk": rnd(ks[3], (1, MODEL_DIM)),
        "wv": rnd(ks[4], (MODEL_DIM, MODEL_DIM)),
        "bv": rnd(ks[5], (1, MODEL_DIM)),
        "wqa": rnd(ks[6], (MODEL_DIM, N_HEADS)),
        "bqa": rnd(ks[7], (1, N_HEADS)),
        "wo": rnd(ks[8], (MODEL_DIM, MODEL_DIM)),
        "bo": rnd(ks[9], (1, MODEL_DIM)),
        "ln2_g": jnp.ones((1, MODEL_DIM), f32),
        "ln2_b": jnp.zeros((1, MODEL_DIM), f32),
        "w1": rnd(ks[10], (MODEL_DIM, MLP_DIM)),
        "b1": jnp.zeros((1, MLP_DIM), f32),
        "w2": rnd(ks[11], (MLP_DIM, MODEL_DIM)),
        "b2": jnp.zeros((1, MODEL_DIM), f32),
    }


if __name__ == "__main__":
    key = jax.random.PRNGKey(0)
    kx, kp = jax.random.split(key)
    x = jax.random.normal(kx, (BATCH, SEQ, MODEL_DIM), dtype=jnp.float32)
    params = init_params(kp)

    # pack once (hoisted out of the per-call path), then call the jitted wrapper
    slab = jax.block_until_ready(pack_params(params))

    y, attn_maps = ladaformer_pallas(x, slab)
    y = jax.block_until_ready(y)
    attn_maps = jax.block_until_ready(attn_maps)

    y_ref, attn_maps_ref = ladaformer_ref(x, params)
    assert y.shape == (BATCH, SEQ, MODEL_DIM)
    assert attn_maps.shape == (BATCH, N_HEADS, SEQ)
    assert jnp.allclose(y, y_ref, atol=1e-5, rtol=1e-5)
    assert jnp.allclose(attn_maps, attn_maps_ref, atol=1e-5, rtol=1e-5)

    print("KERNEL_OK")
</pallas_src>

<mosaic_0001>
module attributes {stable_mosaic.version = 11 : i64} {
  func.func @ladaformer_kernel(%arg0: memref<32x32xf32, #tpu.memory_space<vmem>>, %arg1: memref<168x128xf32, #tpu.memory_space<vmem>>, %arg2: memref<32x128xf32, #tpu.memory_space<vmem>>) attributes {dimension_semantics = [], scalar_prefetch = 0 : i64, scratch_operands = 0 : i64, tpu.core_type = #tpu.core_type<tc>} {
    %c0 = arith.constant 0 : index
    %c0_0 = arith.constant 0 : index
    %0 = vector.load %arg0[%c0, %c0_0] : memref<32x32xf32, #tpu.memory_space<vmem>>, vector<32x32xf32>
    %c0_1 = arith.constant 0 : index
    %c0_2 = arith.constant 0 : index
    %1 = vector.load %arg1[%c0_1, %c0_2] : memref<168x128xf32, #tpu.memory_space<vmem>>, vector<32x128xf32>
    %c32 = arith.constant 32 : index
    %c0_3 = arith.constant 0 : index
    %2 = vector.load %arg1[%c32, %c0_3] : memref<168x128xf32, #tpu.memory_space<vmem>>, vector<32x128xf32>
    %c64 = arith.constant 64 : index
    %c0_4 = arith.constant 0 : index
    %3 = vector.load %arg1[%c64, %c0_4] : memref<168x128xf32, #tpu.memory_space<vmem>>, vector<64x32xf32>
    %c128 = arith.constant 128 : index
    %c0_5 = arith.constant 0 : index
    %4 = vector.load %arg1[%c128, %c0_5] : memref<168x128xf32, #tpu.memory_space<vmem>>, vector<8x128xf32>
    %c136 = arith.constant 136 : index
    %c0_6 = arith.constant 0 : index
    %5 = vector.load %arg1[%c136, %c0_6] : memref<168x128xf32, #tpu.memory_space<vmem>>, vector<32x32xf32>
    %6 = vector.extract_strided_slice %4 {offsets = [0, 0], sizes = [1, 32], strides = [1, 1]} : vector<8x128xf32> to vector<1x32xf32>
    %7 = vector.extract_strided_slice %4 {offsets = [1, 0], sizes = [1, 32], strides = [1, 1]} : vector<8x128xf32> to vector<1x32xf32>
    %8 = vector.extract_strided_slice %4 {offsets = [2, 0], sizes = [1, 128], strides = [1, 1]} : vector<8x128xf32> to vector<1x128xf32>
    %9 = vector.extract_strided_slice %4 {offsets = [3, 0], sizes = [1, 32], strides = [1, 1]} : vector<8x128xf32> to vector<1x32xf32>
    %10 = vector.extract_strided_slice %4 {offsets = [4, 0], sizes = [1, 32], strides = [1, 1]} : vector<8x128xf32> to vector<1x32xf32>
    %11 = vector.extract_strided_slice %4 {offsets = [5, 0], sizes = [1, 32], strides = [1, 1]} : vector<8x128xf32> to vector<1x32xf32>
    %12 = vector.extract_strided_slice %4 {offsets = [6, 0], sizes = [1, 64], strides = [1, 1]} : vector<8x128xf32> to vector<1x64xf32>
    %13 = vector.extract_strided_slice %4 {offsets = [7, 0], sizes = [1, 32], strides = [1, 1]} : vector<8x128xf32> to vector<1x32xf32>
    %cst = arith.constant dense<0.000000e+00> : vector<32xf32>
    %14 = vector.multi_reduction <add>, %0, %cst [1] : vector<32x32xf32> to vector<32xf32>
    %15 = vector.shape_cast %14 : vector<32xf32> to vector<32x1xf32>
    %cst_7 = arith.constant 3.200000e+01 : f32
    %16 = vector.broadcast %cst_7 : f32 to vector<32x1xf32>
    %17 = arith.divf %15, %16 : vector<32x1xf32>
    %18 = vector.broadcast %17 : vector<32x1xf32> to vector<32x32xf32>
    %19 = arith.subf %0, %18 : vector<32x32xf32>
    %20 = arith.mulf %19, %19 : vector<32x32xf32>
    %cst_8 = arith.constant dense<0.000000e+00> : vector<32xf32>
    %21 = vector.multi_reduction <add>, %20, %cst_8 [1] : vector<32x32xf32> to vector<32xf32>
    %22 = vector.shape_cast %21 : vector<32xf32> to vector<32x1xf32>
    %cst_9 = arith.constant 3.200000e+01 : f32
    %23 = vector.broadcast %cst_9 : f32 to vector<32x1xf32>
    %24 = arith.divf %22, %23 : vector<32x1xf32>
    %25 = vector.broadcast %17 : vector<32x1xf32> to vector<32x32xf32>
    %26 = arith.subf %0, %25 : vector<32x32xf32>
    %cst_10 = arith.constant 9.99999997E-7 : f32
    %27 = vector.broadcast %cst_10 : f32 to vector<32x1xf32>
    %28 = arith.addf %24, %27 : vector<32x1xf32>
    %29 = math.rsqrt %28 : vector<32x1xf32>
    %30 = vector.broadcast %29 : vector<32x1xf32> to vector<32x32xf32>
    %31 = arith.mulf %26, %30 : vector<32x32xf32>
    %32 = vector.broadcast %6 : vector<1x32xf32> to vector<32x32xf32>
    %33 = arith.mulf %31, %32 : vector<32x32xf32>
    %34 = vector.broadcast %7 : vector<1x32xf32> to vector<32x32xf32>
    %35 = arith.addf %33, %34 : vector<32x32xf32>
    %cst_11 = arith.constant dense<0.000000e+00> : vector<32x128xf32>
    %36 = tpu.matmul %35, %1, %cst_11 {dimension_numbers = #tpu.dot_dimension_numbers<[1], [0], [0], [1], [0, 0, 1, 1], [], []>} : vector<32x32xf32>, vector<32x128xf32>, vector<32x128xf32> -> vector<32x128xf32>
    %37 = vector.broadcast %8 : vector<1x128xf32> to vector<32x128xf32>
    %38 = arith.addf %36, %37 : vector<32x128xf32>
    %39 = vector.extract_strided_slice %38 {offsets = [0, 0], sizes = [32, 32], strides = [1, 1]} : vector<32x128xf32> to vector<32x32xf32>
    %40 = vector.extract_strided_slice %38 {offsets = [0, 32], sizes = [32, 32], strides = [1, 1]} : vector<32x128xf32> to vector<32x32xf32>
    %41 = vector.extract_strided_slice %38 {offsets = [0, 64], sizes = [32, 32], strides = [1, 1]} : vector<32x128xf32> to vector<32x32xf32>
    %42 = vector.extract_strided_slice %38 {offsets = [0, 96], sizes = [32, 32], strides = [1, 1]} : vector<32x128xf32> to vector<32x32xf32>
    %43 = vector.extract_strided_slice %42 {offsets = [0, 0], sizes = [16, 32], strides = [1, 1]} : vector<32x32xf32> to vector<16x32xf32>
    %cst_12 = arith.constant dense<0xFF800000> : vector<32xf32>
    %44 = vector.multi_reduction <maximumf>, %43, %cst_12 [0] : vector<16x32xf32> to vector<32xf32>
    %45 = vector.shape_cast %44 : vector<32xf32> to vector<1x32xf32>
    %46 = vector.shape_cast %45 : vector<1x32xf32> to vector<1x32xf32>
    %47 = vector.broadcast %46 : vector<1x32xf32> to vector<16x32xf32>
    %48 = vector.extract_strided_slice %42 {offsets = [16, 0], sizes = [16, 32], strides = [1, 1]} : vector<32x32xf32> to vector<16x32xf32>
    %cst_13 = arith.constant dense<0xFF800000> : vector<32xf32>
    %49 = vector.multi_reduction <maximumf>, %48, %cst_13 [0] : vector<16x32xf32> to vector<32xf32>
    %50 = vector.shape_cast %49 : vector<32xf32> to vector<1x32xf32>
    %51 = vector.shape_cast %50 : vector<1x32xf32> to vector<1x32xf32>
    %52 = vector.broadcast %51 : vector<1x32xf32> to vector<16x32xf32>
    %53 = tpu.concatenate %47, %52 in 0 : vector<16x32xf32>, vector<16x32xf32> -> vector<32x32xf32>
    %54 = arith.subf %42, %53 : vector<32x32xf32>
    %55 = math.exp %54 : vector<32x32xf32>
    %56 = arith.mulf %55, %39 : vector<32x32xf32>
    %57 = tpu.concatenate %55, %56 in 1 : vector<32x32xf32>, vector<32x32xf32> -> vector<32x64xf32>
    %cst_14 = arith.constant dense<0.000000e+00> : vector<32x64xf32>
    %58 = tpu.matmul %5, %57, %cst_14 {dimension_numbers = #tpu.dot_dimension_numbers<[1], [0], [0], [1], [0, 0, 1, 1], [], []>} : vector<32x32xf32>, vector<32x64xf32>, vector<32x64xf32> -> vector<32x64xf32>
    %59 = vector.extract_strided_slice %58 {offsets = [0, 0], sizes = [32, 32], strides = [1, 1]} : vector<32x64xf32> to vector<32x32xf32>
    %60 = arith.divf %55, %59 : vector<32x32xf32>
    %61 = vector.extract_strided_slice %58 {offsets = [0, 32], sizes = [32, 32], strides = [1, 1]} : vector<32x64xf32> to vector<32x32xf32>
    %62 = arith.divf %61, %59 : vector<32x32xf32>
    %63 = arith.mulf %62, %40 : vector<32x32xf32>
    %64 = arith.mulf %63, %41 : vector<32x32xf32>
    %65 = vector.extract_strided_slice %2 {offsets = [0, 0], sizes = [32, 32], strides = [1, 1]} : vector<32x128xf32> to vector<32x32xf32>
    %66 = vector.extract_strided_slice %2 {offsets = [0, 32], sizes = [32, 64], strides = [1, 1]} : vector<32x128xf32> to vector<32x64xf32>
    %cst_15 = arith.constant dense<0.000000e+00> : vector<32x32xf32>
    %67 = tpu.matmul %64, %65, %cst_15 {dimension_numbers = #tpu.dot_dimension_numbers<[1], [0], [0], [1], [0, 0, 1, 1], [], []>} : vector<32x32xf32>, vector<32x32xf32>, vector<32x32xf32> -> vector<32x32xf32>
    %68 = arith.addf %0, %67 : vector<32x32xf32>
    %69 = vector.broadcast %9 : vector<1x32xf32> to vector<32x32xf32>
    %70 = arith.addf %68, %69 : vector<32x32xf32>
    %cst_16 = arith.constant dense<0.000000e+00> : vector<32xf32>
    %71 = vector.multi_reduction <add>, %70, %cst_16 [1] : vector<32x32xf32> to vector<32xf32>
    %72 = vector.shape_cast %71 : vector<32xf32> to vector<32x1xf32>
    %cst_17 = arith.constant 3.200000e+01 : f32
    %73 = vector.broadcast %cst_17 : f32 to vector<32x1xf32>
    %74 = arith.divf %72, %73 : vector<32x1xf32>
    %75 = vector.broadcast %74 : vector<32x1xf32> to vector<32x32xf32>
    %76 = arith.subf %70, %75 : vector<32x32xf32>
    %77 = arith.mulf %76, %76 : vector<32x32xf32>
    %cst_18 = arith.constant dense<0.000000e+00> : vector<32xf32>
    %78 = vector.multi_reduction <add>, %77, %cst_18 [1] : vector<32x32xf32> to vector<32xf32>
    %79 = vector.shape_cast %78 : vector<32xf32> to vector<32x1xf32>
    %cst_19 = arith.constant 3.200000e+01 : f32
    %80 = vector.broadcast %cst_19 : f32 to vector<32x1xf32>
    %81 = arith.divf %79, %80 : vector<32x1xf32>
    %82 = vector.broadcast %74 : vector<32x1xf32> to vector<32x32xf32>
    %83 = arith.subf %70, %82 : vector<32x32xf32>
    %cst_20 = arith.constant 9.99999997E-7 : f32
    %84 = vector.broadcast %cst_20 : f32 to vector<32x1xf32>
    %85 = arith.addf %81, %84 : vector<32x1xf32>
    %86 = math.rsqrt %85 : vector<32x1xf32>
    %87 = vector.broadcast %86 : vector<32x1xf32> to vector<32x32xf32>
    %88 = arith.mulf %83, %87 : vector<32x32xf32>
    %89 = vector.broadcast %10 : vector<1x32xf32> to vector<32x32xf32>
    %90 = arith.mulf %88, %89 : vector<32x32xf32>
    %91 = vector.broadcast %11 : vector<1x32xf32> to vector<32x32xf32>
    %92 = arith.addf %90, %91 : vector<32x32xf32>
    %cst_21 = arith.constant dense<0.000000e+00> : vector<32x64xf32>
    %93 = tpu.matmul %92, %66, %cst_21 {dimension_numbers = #tpu.dot_dimension_numbers<[1], [0], [0], [1], [0, 0, 1, 1], [], []>} : vector<32x32xf32>, vector<32x64xf32>, vector<32x64xf32> -> vector<32x64xf32>
    %94 = vector.broadcast %12 : vector<1x64xf32> to vector<32x64xf32>
    %95 = arith.addf %93, %94 : vector<32x64xf32>
    %cst_22 = arith.constant 5.000000e-01 : f32
    %96 = vector.broadcast %cst_22 : f32 to vector<32x64xf32>
    %97 = arith.mulf %96, %95 : vector<32x64xf32>
    %cst_23 = arith.constant 0.707106769 : f32
    %98 = vector.broadcast %cst_23 : f32 to vector<32x64xf32>
    %99 = arith.mulf %95, %98 : vector<32x64xf32>
    %100 = math.erf %99 : vector<32x64xf32>
    %cst_24 = arith.constant 1.000000e+00 : f32
    %101 = vector.broadcast %cst_24 : f32 to vector<32x64xf32>
    %102 = arith.addf %101, %100 : vector<32x64xf32>
    %103 = arith.mulf %97, %102 : vector<32x64xf32>
    %cst_25 = arith.constant dense<0.000000e+00> : vector<32x32xf32>
    %104 = tpu.matmul %103, %3, %cst_25 {dimension_numbers = #tpu.dot_dimension_numbers<[1], [0], [0], [1], [0, 0, 1, 1], [], []>} : vector<32x64xf32>, vector<64x32xf32>, vector<32x32xf32> -> vector<32x32xf32>
    %105 = vector.broadcast %13 : vector<1x32xf32> to vector<32x32xf32>
    %106 = arith.addf %104, %105 : vector<32x32xf32>
    %107 = arith.addf %106, %70 : vector<32x32xf32>
    %cst_26 = arith.constant 0.000000e+00 : f32
    %108 = vector.broadcast %cst_26 : f32 to vector<32x64xf32>
    %109 = tpu.concatenate %107, %60, %108 in 1 : vector<32x32xf32>, vector<32x32xf32>, vector<32x64xf32> -> vector<32x128xf32>
    %c0_27 = arith.constant 0 : index
    %c0_28 = arith.constant 0 : index
    %110 = vector.load %arg2[%c0_27, %c0_28] : memref<32x128xf32, #tpu.memory_space<vmem>>, vector<32x128xf32>
    tpu.vector_store %arg2[%c0_27, %c0_28], %109 {strides = array<i32>} : memref<32x128xf32, #tpu.memory_space<vmem>>, vector<32x128xf32>,
    return
  }
}

</mosaic_0001>

<bundles_post_ra>
// kernel: ladaformer_pallas.1
= control target key start
LH: loop header
LB: loop body
LE: loop exit
PB: predicated region body
PF: predicated region fallthrough
CT: control target
= control target key end

     0   :  { %7 = vsyncpa [#allocation3], 0  ;;  %s1561_s0 = inlined_call_operand.hbm [shape: f32[32,32], index: 0, kind: input, shape index: {}]   ;;  %s1562_s1 = inlined_call_operand.hbm [shape: f32[168,128], index: 1, kind: input, shape index: {}]   ;;  %s1563_s2 = inlined_call_operand.vmem [shape: f32[32,128], index: 2, kind: output, shape index: {}]  }
   0x1   :  { %8 = vsyncpa [#allocation5], 0  ;;  %s1256_s9 = smov [#allocation2]   ;;  %s1208_s13 = scalar_lea.hbm %s1561_s0, 512 }
   0x2   :  { %s14_s10 = sshll.u32 %s1256_s9, 4  ;;  %p1209_p0 = scmp.ne.s32.totalorder %s1561_s0, %s1208_s13  ;;  %s15_s10 = int_to_ptr.vmem [resolvable:$true] %s14_s10 }
   0x3   :  { %p1212_p1 = scmp.lt.u32.totalorder %s1208_s13, %s1561_s0 }
   0x5   :  { %p1214_p2 = pnand %p1212_p1, %p1209_p0 }
   0x7   :  { %1217 = shalt.err (!%p1214_p2)
}
   0x8   :  { %s1218_s18 = scalar_lea.vmem %s15_s10, 512  ;;  %p1223_p4 = scmp.lt.s32.totalorder %s15_s10, %s15_s10 }
   0x9   :  { %p1219_p3 = scmp.ne.s32.totalorder %s15_s10, %s1218_s18  ;;  %p1224_p5 = scmp.lt.s32.totalorder %s1218_s18, %s1218_s18 }
   0xb   :  { %p1225_p6 = por %p1224_p5, %p1223_p4 }
   0xd   :  { %p1226_p7 = pnand %p1225_p6, %p1219_p3 }
   0xf   :  { %1229 = shalt.err (!%p1226_p7)
}
  0x10   :  { %s1257_s19 = smov 128   ;;  %s1258_s20 = smov 8  }
  0x11   :  { %20 = dma.hbm_to_vmem [thread:$0]  %s1561_s0, 512, %s15_s10, [#allocation3], %s1257_s19, %s1257_s19, %s1258_s20  }
  0x12   :  { %s1259_s23 = smov [#allocation4]   ;;  %s1230_s27 = scalar_lea.hbm %s1562_s1, 2688 }
  0x13   :  { %s26_s24 = sshll.u32 %s1259_s23, 4  ;;  %p1231_p8 = scmp.ne.s32.totalorder %s1562_s1, %s1230_s27  ;;  %s27_s24 = int_to_ptr.vmem [resolvable:$true] %s26_s24 }
  0x14   :  { %p1234_p9 = scmp.lt.u32.totalorder %s1230_s27, %s1562_s1 }
  0x16   :  { %p1236_p10 = pnand %p1234_p9, %p1231_p8 }
  0x18   :  { %1239 = shalt.err (!%p1236_p10)
}
  0x19   :  { %s1240_s4 = scalar_lea.vmem %s27_s24, 2688  ;;  %p1245_p12 = scmp.lt.s32.totalorder %s27_s24, %s27_s24 }
  0x1a   :  { %p1241_p11 = scmp.ne.s32.totalorder %s27_s24, %s1240_s4  ;;  %p1246_p13 = scmp.lt.s32.totalorder %s1240_s4, %s1240_s4 }
  0x1c   :  { %p1247_p0 = por %p1246_p13, %p1245_p12 }
  0x1e   :  { %p1248_p1 = pnand %p1247_p0, %p1241_p11 }
  0x20   :  { %1251 = shalt.err (!%p1248_p1)
}
  0x21   :  { %32 = dma.hbm_to_vmem [thread:$0]  %s1562_s1, 2688, %s27_s24, [#allocation5], %s1257_s19, %s1257_s19, %s1258_s20  }
  0x22   :  { %1252 = dma.done.wait [#allocation3], 512  }
  0x23   :  { %1253 = vsyncadd [#allocation3], 4294966784 }
  0x24   :  { %1254 = dma.done.wait [#allocation5], 2688  }
  0x25   :  { %1255 = vsyncadd [#allocation5], 4294964608  ;;  %vm64_vm0 = vcmask 261120   ;;  %v1302_v0 = vld [vmem:[#allocation2] sm:$0xff]  ;;  %v1304_v1 = vld [vmem:[#allocation2 + $0x10] sm:$0xff]  ;;  %v118_v36 = vlaneseq  ;;  %vm235_vm1 = vcmask 1048320  }
  0x26   :  { %v1306_v2 = vld [vmem:[#allocation2 + $0x8] sm:$0xff]  ;;  %v65_v3 = vsel %vm64_vm0, %v1302_v0, 0.0  ;;  %v71_v4 = vsel %vm64_vm0, %v1304_v1, 0.0  ;;  %v1312_v5 = vld [vmem:[#allocation2 + $0x18] sm:$0xff]  ;;  %v43_v28 = vld [vmem:[#allocation4] sm:$0xff]  ;;  %s1260_s1 = smov 96  }
  0x27   :  { %66 = vadd.xlane.f32.xlu0 %v65_v3  ;;  %72 = vadd.xlane.f32.xlu1 %v71_v4  ;;  %v68_v6 = vsel %vm64_vm0, %v1306_v2, 0.0  ;;  %v74_v7 = vsel %vm64_vm0, %v1312_v5, 0.0  ;;  %v44_v29 = vld [vmem:[#allocation4 + $0x8] sm:$0xff]  ;;  %v45_v30 = vld [vmem:[#allocation4 + $0x10] sm:$0xff]  ;;  %v46_v32 = vld [vmem:[#allocation4 + $0x18] sm:$0xff]  ;;  %v1326_v42 = vshrl.u32 %v118_v36, 7 }
  0x28   :  { %v1075_v31 = vpack.c.bf16 %v44_v29, %v43_v28  ;;  %v1079_v33 = vpack.c.bf16 %v46_v32, %v45_v30  ;;  %v1329_v49 = vld [vmem:[#allocation4 + $0x80] sm:$0xff]  ;;  %s1261_s6 = smov 32   ;;  %s1262_s7 = smov 64   ;;  %vm797_vm2 = vcmask 523264  }
  0x29   :  { %v120_v47 = vsub.s32 0, %v1326_v42  ;;  %v128_v50 = vsub.s32 1, %v1326_v42 }
  0x2a   :  { %1076 = vmatprep.subr.bf16.mxu1 %v1075_v31 }
  0x2b   :  { %69 = vadd.xlane.f32.xlu0 %v68_v6  ;;  %75 = vadd.xlane.f32.xlu1 %v74_v7  ;;  %v121_v51 = vrot.slane %v1329_v49, %v120_v47  ;;  %v129_v54 = vrot.slane %v1329_v49, %v128_v50 }
  0x2c   :  { %1078 = vmatpush3.bf16.msra.mxu1 %v1075_v31 }
  0x2d   :  { %1080 = vmatprep.subr.bf16.mxu1 %v1079_v33 }
  0x30   :  { %1082 = vmatpush3.bf16.msra.mxu1 %v1079_v33 }
  0xb4   :  { %v67_v8 = vpop.xlane.xlu0 %66  ;;  %v73_v9 = vpop.xlane.xlu1 %72 }
  0xb5   :  { %v78_v10 = vmul.f32 0.03125, %v67_v8  ;;  %v80_v11 = vmul.f32 0.03125, %v73_v9  ;;  %v136_v9 = vsub.s32 2, %v1326_v42 }
  0xb7   :  { %v82_v12 = vsub.f32 %v1302_v0, %v78_v10  ;;  %v84_v13 = vsub.f32 %v1304_v1, %v80_v11  ;;  %v137_v10 = vrot.slane %v1329_v49, %v136_v9 }
  0xb8   :  { %v70_v14 = vpop.xlane.xlu0 %69  ;;  %v76_v15 = vpop.xlane.xlu1 %75 }
  0xb9   :  { %v79_v16 = vmul.f32 0.03125, %v70_v14  ;;  %v81_v17 = vmul.f32 0.03125, %v76_v15  ;;  %v86_v18 = vmul.f32 %v82_v12, %v82_v12  ;;  %v88_v19 = vmul.f32 %v84_v13, %v84_v13 }
  0xbb   :  { %v83_v20 = vsub.f32 %v1306_v2, %v79_v16  ;;  %v85_v21 = vsub.f32 %v1312_v5, %v81_v17  ;;  %v90_v22 = vsel %vm64_vm0, %v86_v18, 0.0  ;;  %v96_v23 = vsel %vm64_vm0, %v88_v19, 0.0 }
  0xbc   :  { %91 = vadd.xlane.f32.xlu0 %v90_v22 }
  0xbd   :  { %v87_v24 = vmul.f32 %v83_v20, %v83_v20  ;;  %v89_v25 = vmul.f32 %v85_v21, %v85_v21 }
  0xbf   :  { %v93_v26 = vsel %vm64_vm0, %v87_v24, 0.0  ;;  %v99_v27 = vsel %vm64_vm0, %v89_v25, 0.0 }
  0xc0   :  { %97 = vadd.xlane.f32.xlu0 %v96_v23  ;;  %94 = vadd.xlane.f32.xlu1 %v93_v26 }
  0xc4   :  { %100 = vadd.xlane.f32.xlu1 %v99_v27 }
 0x149   :  { %v92_v34 = vpop.xlane.xlu0 %91 }
 0x14a   :  { %v102_v35 = vmul.f32 0.03125, %v92_v34 }
 0x14c   :  { %v106_v37 = vadd.f32 1e-06, %v102_v35 }
 0x14d   :  { %v95_v38 = vpop.xlane.xlu1 %94  ;;  %v98_v39 = vpop.xlane.xlu0 %97 }
 0x14e   :  { %1160 = vrsqrt.f32 %v106_v37  ;;  %v103_v40 = vmul.f32 0.03125, %v95_v38  ;;  %v104_v41 = vmul.f32 0.03125, %v98_v39 }
 0x150   :  { %v107_v43 = vadd.f32 1e-06, %v103_v40  ;;  %v108_v44 = vadd.f32 1e-06, %v104_v41 }
 0x151   :  { %v101_v45 = vpop.xlane.xlu1 %100 }
 0x152   :  { %1162 = vrsqrt.f32 %v107_v43  ;;  %v105_v46 = vmul.f32 0.03125, %v101_v45 }
 0x153   :  { %1164 = vrsqrt.f32 %v108_v44 }
 0x154   :  { %v109_v48 = vadd.f32 1e-06, %v105_v46 }
 0x156   :  { %1166 = vrsqrt.f32 %v109_v48 }
 0x158   :  { %v1161_v52 = vpop.eup %1160 }
 0x159   :  { %v114_v53 = vmul.f32 %v1161_v52, %v82_v12 }
 0x15b   :  { %v122_v55 = vmul.f32 %v121_v51, %v114_v53 }
 0x15c   :  { %v1163_v56 = vpop.eup %1162 }
 0x15d   :  { %v1165_v57 = vpop.eup %1164  ;;  %v130_v58 = vadd.f32 %v129_v54, %v122_v55  ;;  %v115_v59 = vmul.f32 %v1163_v56, %v83_v20 }
 0x15e   :  { %v116_v60 = vmul.f32 %v1165_v57, %v84_v13 }
 0x15f   :  { %1005 = vmatprep.mubr.msk.f32.mxu1 %vm64_vm0, %v130_v58  ;;  %v123_v61 = vmul.f32 %v121_v51, %v115_v59  ;;  %v60_v59 = vld [vmem:[#allocation4 + $0x88] sm:$0xff] }
 0x160   :  { %v1167_v62 = vpop.eup %1166  ;;  %v124_v63 = vmul.f32 %v121_v51, %v116_v60 }
 0x161   :  { %v131_v3 = vadd.f32 %v129_v54, %v123_v61  ;;  %v117_v4 = vmul.f32 %v1167_v62, %v85_v21 }
 0x162   :  { %v132_v6 = vadd.f32 %v129_v54, %v124_v63 }
 0x163   :  { %1006 = vmatmul.mubr.msk.f32.vlgmr.msra.gmra.mrb[0].mxu1 %vm64_vm0, %v131_v3  ;;  %v125_v7 = vmul.f32 %v121_v51, %v117_v4 }
 0x164   :  { %1008 = vmatprep.mubr.msk.f32.mxu1 %vm64_vm0, %v132_v6 }
 0x165   :  { %v133_v8 = vadd.f32 %v129_v54, %v125_v7 }
 0x167   :  { %1009 = vmatmul.mubr.msk.f32.gmra.mrb[2].mxu1 %vm64_vm0, %v133_v8 }
 0x168   :  { %1019 = vmatprep.mubr.msk.f32.mxu1 %vm64_vm0, %v60_v59 }
 0x236   :  { %v1007_v11 = vpop.f32.mrb[0].mxu1 }
 0x237   :  { %v1340_v12 = vadd.f32 %v1007_v11, %v137_v10  ;;  %v216_v13 = vpop.f32.mrb[1].mxu1 }
 0x238   :  { %v1342_v14 = vadd.f32 %v216_v13, %v137_v10 }
 0x239   :  { %v237_v15 = vsel %vm235_vm1, %v1340_v12, -inf  ;;  %272 = vrot.lane.b32.xlu1 %v1340_v12, %s1260_s1 }
 0x23a   :  { %v236_v16 = vsel %vm235_vm1, %v1342_v14, -inf  ;;  %270 = vrot.lane.b32.xlu0 %v1342_v14, %s1260_s1  ;;  %v1010_v17 = vpop.f32.mrb[2].mxu1 }
 0x23b   :  { %v238_v18 = vmax.f32 %v236_v16, %v237_v15  ;;  %v1352_v19 = vadd.f32 %v1010_v17, %v137_v10  ;;  %v226_v20 = vpop.f32.mrb[3].mxu1 }
 0x23c   :  { %v1354_v21 = vadd.f32 %v226_v20, %v137_v10 }
 0x23d   :  { %v239_v22 = vrot.slane %v238_v18, 4  ;;  %v246_v23 = vsel %vm235_vm1, %v1352_v19, -inf }
 0x23e   :  { %v245_v24 = vsel %vm235_vm1, %v1354_v21, -inf  ;;  %274 = vrot.lane.b32.xlu1 %v1354_v21, %s1260_s1 }
 0x23f   :  { %v240_v25 = vmax.f32 %v238_v18, %v239_v22  ;;  %v247_v26 = vmax.f32 %v245_v24, %v246_v23 }
 0x241   :  { %v241_v27 = vrot.slane %v240_v25, 2  ;;  %v248_v28 = vrot.slane %v247_v26, 4 }
 0x242   :  { %276 = vrot.lane.b32.xlu1 %v1352_v19, %s1260_s1 }
 0x243   :  { %v242_v29 = vmax.f32 %v240_v25, %v241_v27  ;;  %v249_v30 = vmax.f32 %v247_v26, %v248_v28  ;;  %v61_v26 = vld [vmem:[#allocation4 + $0x90] sm:$0xff]  ;;  %v62_v27 = vld [vmem:[#allocation4 + $0x98] sm:$0xff]  ;;  %v63_v28 = vld [vmem:[#allocation4 + $0xa0] sm:$0xff] }
 0x245   :  { %v243_v31 = vrot.slane %v242_v29, 1  ;;  %v250_v32 = vrot.slane %v249_v30, 2 }
 0x247   :  { %v244_v33 = vmax.f32 %v242_v29, %v243_v31  ;;  %v251_v34 = vmax.f32 %v249_v30, %v250_v32 }
 0x249   :  { %v254_v35 = vsub.f32 %v1342_v14, %v244_v33  ;;  %v255_v36 = vsub.f32 %v1340_v12, %v244_v33  ;;  %v252_v37 = vrot.slane %v251_v34, 1  ;;  %v1424_v33 = vld [vmem:[#allocation4 + $0x20] sm:$0xff] }
 0x24b   :  { %v258_v38 = vmul.f32 1.442695, %v254_v35  ;;  %v260_v39 = vmul.f32 1.442695, %v255_v36  ;;  %v253_v40 = vmax.f32 %v251_v34, %v252_v37  ;;  %v1426_v34 = vld [vmem:[#allocation4 + $0x28] sm:$0xff]  ;;  %v1428_v35 = vld [vmem:[#allocation4 + $0x30] sm:$0xff] }
 0x24c   :  { %v1150_v36 = vpack.i.bf16 %v1426_v34, %v1424_v33  ;;  %v1091_v37 = vpack.c.bf16 %v1426_v34, %v1424_v33 }
 0x24d   :  { %1168 = vpow2.f32 %v258_v38  ;;  %v256_v41 = vsub.f32 %v1354_v21, %v253_v40  ;;  %v257_v43 = vsub.f32 %v1352_v19, %v253_v40  ;;  %v1434_v38 = vld [vmem:[#allocation4 + $0x38] sm:$0xff] }
 0x24e   :  { %1170 = vpow2.f32 %v260_v39  ;;  %v1095_v39 = vpack.c.bf16 %v1434_v38, %v1428_v35  ;;  %1092 = vmatprep.subr.bf16.mxu0 %v1091_v37 }
 0x24f   :  { %v262_v44 = vmul.f32 1.442695, %v256_v41  ;;  %v264_v45 = vmul.f32 1.442695, %v257_v43  ;;  %1094 = vmatpush3.bf16.msra.mxu0 %v1091_v37 }
 0x250   :  { %1096 = vmatprep.subr.bf16.mxu0 %v1095_v39 }
 0x251   :  { %1172 = vpow2.f32 %v262_v44 }
 0x252   :  { %1174 = vpow2.f32 %v264_v45 }
 0x253   :  { %1098 = vmatpush3.bf16.msra.mxu0 %v1095_v39 }
 0x257   :  { %v1368_v46 = vpop.eup %1168 }
 0x258   :  { %v1370_v47 = vpop.eup %1170 }
 0x259   :  { %v1130_v48 = vpack.i.bf16 %v1370_v47, %v1368_v46 }
 0x25b   :  { %v1374_v50 = vpop.eup %1172  ;;  %1131 = vrot.lane.b32.xlu0 %v1130_v48, %s1261_s6 }
 0x25c   :  { %v1377_v51 = vpop.eup %1174 }
 0x25d   :  { %v1135_v52 = vpack.i.bf16 %v1377_v51, %v1374_v50 }
 0x25f   :  { %1136 = vrot.lane.b32.xlu0 %v1135_v52, %s1261_s6 }
 0x2ab   :  { %v1382_v53 = vpop.permute.xlu1 %272 }
 0x2ac   :  { %v283_v54 = vmul.f32 %v1370_v47, %v1382_v53  ;;  %v1386_v55 = vpop.permute.xlu0 %270 }
 0x2ad   :  { %v282_v56 = vmul.f32 %v1368_v46, %v1386_v55 }
 0x2af   :  { %v1140_v57 = vpack.i.bf16 %v283_v54, %v282_v56 }
 0x2b0   :  { %v1390_v58 = vpop.permute.xlu1 %274 }
 0x2b1   :  { %1141 = vrot.lane.b32.xlu1 %v1140_v57, %s1262_s7  ;;  %v284_v61 = vmul.f32 %v1374_v50, %v1390_v58 }
 0x2b4   :  { %v1394_v60 = vpop.permute.xlu1 %276 }
 0x2b5   :  { %v285_v62 = vmul.f32 %v1377_v51, %v1394_v60 }
 0x2b7   :  { %v1145_v63 = vpack.i.bf16 %v285_v62, %v284_v61 }
 0x2b9   :  { %1146 = vrot.lane.b32.xlu1 %v1145_v63, %s1262_s7 }
 0x2cd   :  { %v1132_v3 = vpop.permute.xlu0 %1131 }
 0x2ce   :  { %v1134_v6 = vunpack.i.h.bf16 %v1132_v3  ;;  %v1133_v7 = vunpack.i.l.bf16 %v1132_v3 }
 0x2d1   :  { %v1137_v15 = vpop.permute.xlu0 %1136 }
 0x2d2   :  { %v1139_v17 = vunpack.i.h.bf16 %v1137_v15  ;;  %v1138_v18 = vunpack.i.l.bf16 %v1137_v15 }
 0x323   :  { %v1142_v4 = vpop.permute.xlu1 %1141 }
 0x324   :  { %v1144_v8 = vunpack.i.h.bf16 %v1142_v4  ;;  %v1143_v9 = vunpack.i.l.bf16 %v1142_v4 }
 0x326   :  { %v318_v10 = vsel %vm64_vm0, %v1133_v7, %v1143_v9  ;;  %v319_v11 = vsel %vm64_vm0, %v1134_v6, %v1144_v8 }
 0x327   :  { %v1083_v13 = vpack.c.bf16 %v319_v11, %v318_v10 }
 0x329   :  { %1084 = vmatprep.subr.bf16.mxu1 %v1083_v13 }
 0x32a   :  { %1086 = vmatpush3.bf16.msra.mxu1 %v1083_v13 }
 0x32b   :  { %v1147_v16 = vpop.permute.xlu1 %1146 }
 0x32c   :  { %v1149_v20 = vunpack.i.h.bf16 %v1147_v16  ;;  %v1148_v22 = vunpack.i.l.bf16 %v1147_v16 }
 0x32e   :  { %v320_v23 = vsel %vm64_vm0, %v1138_v18, %v1148_v22  ;;  %v321_v24 = vsel %vm64_vm0, %v1139_v17, %v1149_v20 }
 0x32f   :  { %v1087_v25 = vpack.c.bf16 %v321_v24, %v320_v23 }
 0x331   :  { %1088 = vmatprep.subr.bf16.mxu1 %v1087_v25 }
 0x332   :  { %1090 = vmatpush3.bf16.msra.mxu1 %v1087_v25 }
 0x335   :  { %1020 = vmatmul.mubr.msk.f32.vlgmr.msra.gmra.mrb[4].mxu1 %vm64_vm0, %v61_v26 }
 0x336   :  { %1022 = vmatprep.mubr.msk.f32.mxu1 %vm64_vm0, %v62_v27 }
 0x339   :  { %1023 = vmatmul.mubr.msk.f32.gmra.mrb[6].mxu1 %vm64_vm0, %v63_v28 }
 0x408   :  { %v1408_v29 = vpop.f32.mrb[4].mxu1 }
 0x409   :  { %445 = vrot.lane.b32.xlu1 %v1408_v29, %s1261_s6  ;;  %v1412_v30 = vpop.f32.mrb[5].mxu1 }
 0x40a   :  { %443 = vrot.lane.b32.xlu0 %v1412_v30, %s1261_s6 }
 0x40c   :  { %v1416_v31 = vpop.f32.mrb[6].mxu1 }
 0x40d   :  { %449 = vrot.lane.b32.xlu1 %v1416_v31, %s1261_s6  ;;  %v1420_v32 = vpop.f32.mrb[7].mxu1 }
 0x40e   :  { %447 = vrot.lane.b32.xlu0 %v1420_v32, %s1261_s6 }
 0x47b   :  { %v446_v40 = vpop.permute.xlu1 %445 }
 0x47c   :  { %1176 = vrcp.f32 %v446_v40  ;;  %v444_v41 = vpop.permute.xlu0 %443 }
 0x47d   :  { %1178 = vrcp.f32 %v444_v41 }
 0x47f   :  { %v450_v43 = vpop.permute.xlu1 %449 }
 0x480   :  { %1180 = vrcp.f32 %v450_v43  ;;  %v448_v44 = vpop.permute.xlu0 %447 }
 0x481   :  { %1182 = vrcp.f32 %v448_v44 }
 0x486   :  { %v1177_v45 = vpop.eup %1176 }
 0x487   :  { %v1179_v48 = vpop.eup %1178  ;;  %v458_v52 = vmul.f32 %v1177_v45, %v1408_v29 }
 0x488   :  { %v456_v54 = vmul.f32 %v1179_v48, %v1412_v30 }
 0x489   :  { %v464_v56 = vmul.f32 %v458_v52, %v1340_v12 }
 0x48a   :  { %v1181_v57 = vpop.eup %1180  ;;  %v463_v59 = vmul.f32 %v456_v54, %v1342_v14 }
 0x48b   :  { %v1183_v61 = vpop.eup %1182  ;;  %v468_v62 = vmul.f32 %v464_v56, %v1382_v53  ;;  %v462_v63 = vmul.f32 %v1181_v57, %v1416_v31 }
 0x48c   :  { %v467_v3 = vmul.f32 %v463_v59, %v1386_v55  ;;  %v460_v4 = vmul.f32 %v1183_v61, %v1420_v32 }
 0x48d   :  { %477 = vrot.lane.b32.xlu1 %v468_v62, %s1260_s1  ;;  %v466_v6 = vmul.f32 %v462_v63, %v1352_v19  ;;  %v1155_v63 = vpack.i.bf16 %v1434_v38, %v1428_v35 }
 0x48e   :  { %475 = vrot.lane.b32.xlu0 %v467_v3, %s1260_s1  ;;  %v465_v12 = vmul.f32 %v460_v4, %v1354_v21  ;;  %v582_v21 = vsub.s32 3, %v1326_v42 }
 0x48f   :  { %v470_v7 = vmul.f32 %v466_v6, %v1394_v60 }
 0x490   :  { %v469_v14 = vmul.f32 %v465_v12, %v1390_v58  ;;  %v583_v58 = vrot.slane %v1329_v49, %v582_v21 }
 0x491   :  { %481 = vrot.lane.b32.xlu1 %v470_v7, %s1260_s1 }
 0x492   :  { %479 = vrot.lane.b32.xlu0 %v469_v14, %s1260_s1 }
 0x4ff   :  { %v478_v53 = vpop.permute.xlu1 %477 }
 0x500   :  { %v476_v55 = vpop.permute.xlu0 %475 }
 0x501   :  { %1033 = vmatprep.mubr.msk.f32.mxu0 %vm64_vm0, %v476_v55 }
 0x502   :  { %1034 = vmatmul.mubr.msk.f32.vlgmr.msra.gmra.mrb[0].mxu0 %vm64_vm0, %v478_v53 }
 0x503   :  { %v482_v19 = vpop.permute.xlu1 %481 }
 0x504   :  { %v480_v8 = vpop.permute.xlu0 %479 }
 0x505   :  { %1036 = vmatprep.mubr.msk.f32.mxu0 %vm64_vm0, %v480_v8 }
 0x506   :  { %1037 = vmatmul.mubr.msk.f32.gmra.mrb[2].mxu0 %vm64_vm0, %v482_v19  ;;  %v650_v19 = vsub.s32 5, %v1326_v42 }
 0x5d5   :  { %v1035_v60 = vpop.f32.mrb[0].mxu0 }
 0x5d6   :  { %v577_v9 = vadd.f32 %v1035_v60, %v1306_v2  ;;  %v557_v10 = vpop.f32.mrb[1].mxu0 }
 0x5d7   :  { %v576_v11 = vadd.f32 %v557_v10, %v1302_v0 }
 0x5d8   :  { %v1462_v13 = vadd.f32 %v583_v58, %v577_v9 }
 0x5d9   :  { %v1464_v15 = vadd.f32 %v583_v58, %v576_v11  ;;  %v1038_v16 = vpop.f32.mrb[2].mxu0 }
 0x5da   :  { %v567_v17 = vpop.f32.mrb[3].mxu0  ;;  %v591_v18 = vsel %vm64_vm0, %v1462_v13, 0.0  ;;  %v579_v20 = vadd.f32 %v1038_v16, %v1312_v5 }
 0x5db   :  { %v578_v22 = vadd.f32 %v567_v17, %v1304_v1  ;;  %592 = vadd.xlane.f32.xlu1 %v591_v18  ;;  %v588_v2 = vsel %vm64_vm0, %v1464_v15, 0.0 }
 0x5dc   :  { %589 = vadd.xlane.f32.xlu0 %v588_v2  ;;  %v1474_v0 = vadd.f32 %v583_v58, %v579_v20 }
 0x5dd   :  { %v1472_v23 = vadd.f32 %v583_v58, %v578_v22  ;;  %v651_v22 = vrot.slane %v1329_v49, %v650_v19 }
 0x5de   :  { %v597_v25 = vsel %vm64_vm0, %v1474_v0, 0.0 }
 0x5df   :  { %v594_v24 = vsel %vm64_vm0, %v1472_v23, 0.0 }
 0x5e0   :  { %595 = vadd.xlane.f32.xlu0 %v594_v24 }
 0x5e4   :  { %598 = vadd.xlane.f32.xlu0 %v597_v25 }
 0x668   :  { %v593_v5 = vpop.xlane.xlu1 %592 }
 0x669   :  { %v601_v26 = vmul.f32 0.03125, %v593_v5  ;;  %v590_v1 = vpop.xlane.xlu0 %589 }
 0x66a   :  { %v600_v27 = vmul.f32 0.03125, %v590_v1 }
 0x66b   :  { %v605_v28 = vsub.f32 %v1462_v13, %v601_v26 }
 0x66c   :  { %v604_v37 = vsub.f32 %v1464_v15, %v600_v27 }
 0x66d   :  { %v596_v39 = vpop.xlane.xlu0 %595  ;;  %v609_v40 = vmul.f32 %v605_v28, %v605_v28 }
 0x66e   :  { %v602_v41 = vmul.f32 0.03125, %v596_v39  ;;  %v608_v43 = vmul.f32 %v604_v37, %v604_v37 }
 0x66f   :  { %v615_v44 = vsel %vm64_vm0, %v609_v40, 0.0 }
 0x670   :  { %v1484_v45 = vsub.f32 %v1472_v23, %v602_v41  ;;  %616 = vadd.xlane.f32.xlu1 %v615_v44  ;;  %v612_v48 = vsel %vm64_vm0, %v608_v43, 0.0 }
 0x671   :  { %613 = vadd.xlane.f32.xlu0 %v612_v48  ;;  %v599_v52 = vpop.xlane.xlu0 %598 }
 0x672   :  { %v603_v54 = vmul.f32 0.03125, %v599_v52  ;;  %v610_v56 = vmul.f32 %v1484_v45, %v1484_v45 }
 0x674   :  { %v1490_v57 = vsub.f32 %v1474_v0, %v603_v54  ;;  %v618_v59 = vsel %vm64_vm0, %v610_v56, 0.0 }
 0x675   :  { %619 = vadd.xlane.f32.xlu0 %v618_v59 }
 0x676   :  { %v611_v61 = vmul.f32 %v1490_v57, %v1490_v57 }
 0x678   :  { %v621_v62 = vsel %vm64_vm0, %v611_v61, 0.0 }
 0x679   :  { %622 = vadd.xlane.f32.xlu1 %v621_v62  ;;  %v52_v62 = vld [vmem:[#allocation4 + $0x48] sm:$0xff] }
 0x68a   :  { %1156 = vrot.lane.b32.xlu1 %v1155_v63, %s1260_s1 }
 0x68b   :  { %1151 = vrot.lane.b32.xlu0 %v1150_v36, %s1260_s1  ;;  %v642_v36 = vsub.s32 4, %v1326_v42 }
 0x68d   :  { %v643_v21 = vrot.slane %v1329_v49, %v642_v36 }
 0x68e   :  { %423 = vrot.lane.b32.xlu1 %v1412_v30, %s1260_s1 }
 0x68f   :  { %427 = vrot.lane.b32.xlu0 %v1420_v32, %s1260_s1 }
 0x692   :  { %425 = vrot.lane.b32.xlu1 %v1408_v29, %s1260_s1 }
 0x696   :  { %429 = vrot.lane.b32.xlu1 %v1416_v31, %s1260_s1 }
 0x6fd   :  { %v617_v35 = vpop.xlane.xlu1 %616 }
 0x6fe   :  { %v625_v38 = vmul.f32 0.03125, %v617_v35  ;;  %v614_v3 = vpop.xlane.xlu0 %613  ;;  %v53_v35 = vld [vmem:[#allocation4 + $0x50] sm:$0xff] }
 0x6ff   :  { %v624_v4 = vmul.f32 0.03125, %v614_v3 }
 0x700   :  { %v629_v6 = vadd.f32 1e-06, %v625_v38  ;;  %v54_v38 = vld [vmem:[#allocation4 + $0x58] sm:$0xff] }
 0x701   :  { %v628_v12 = vadd.f32 1e-06, %v624_v4  ;;  %v1111_v3 = vpack.c.bf16 %v54_v38, %v53_v35 }
 0x702   :  { %1184 = vrsqrt.f32 %v629_v6  ;;  %v620_v33 = vpop.xlane.xlu0 %619  ;;  %v57_v6 = vld [vmem:[#allocation4 + $0x70] sm:$0xff] }
 0x703   :  { %1186 = vrsqrt.f32 %v628_v12  ;;  %v626_v34 = vmul.f32 0.03125, %v620_v33  ;;  %v58_v12 = vld [vmem:[#allocation4 + $0x78] sm:$0xff]  ;;  %v658_v33 = vsub.s32 6, %v1326_v42 }
 0x705   :  { %v630_v30 = vadd.f32 1e-06, %v626_v34  ;;  %v659_v34 = vrot.slane %v1329_v49, %v658_v33 }
 0x706   :  { %v623_v32 = vpop.xlane.xlu1 %622  ;;  %v1152_v7 = vpop.permute.xlu0 %1151 }
 0x707   :  { %1188 = vrsqrt.f32 %v630_v30  ;;  %v627_v29 = vmul.f32 0.03125, %v623_v32  ;;  %v1154_v14 = vunpack.i.h.bf16 %v1152_v7  ;;  %v1153_v53 = vunpack.i.l.bf16 %v1152_v7 }
 0x709   :  { %v631_v31 = vadd.f32 1e-06, %v627_v29  ;;  %v1099_v55 = vpack.c.bf16 %v1154_v14, %v1153_v53 }
 0x70a   :  { %v1157_v8 = vpop.permute.xlu1 %1156  ;;  %v428_v17 = vpop.permute.xlu0 %427 }
 0x70b   :  { %1190 = vrsqrt.f32 %v631_v31  ;;  %v1159_v58 = vunpack.i.h.bf16 %v1157_v8  ;;  %v1158_v60 = vunpack.i.l.bf16 %v1157_v8  ;;  %1100 = vmatprep.subr.bf16.mxu1 %v1099_v55 }
 0x70c   :  { %v1185_v9 = vpop.eup %1184  ;;  %1102 = vmatpush3.bf16.msra.mxu1 %v1099_v55 }
 0x70d   :  { %v1187_v10 = vpop.eup %1186  ;;  %v637_v11 = vmul.f32 %v1185_v9, %v605_v28  ;;  %v1103_v16 = vpack.c.bf16 %v1159_v58, %v1158_v60 }
 0x70e   :  { %v424_v18 = vpop.permute.xlu1 %423  ;;  %v636_v20 = vmul.f32 %v1187_v10, %v604_v37 }
 0x70f   :  { %v645_v2 = vmul.f32 %v643_v21, %v637_v11  ;;  %1192 = vrcp.f32 %v424_v18  ;;  %1104 = vmatprep.subr.bf16.mxu1 %v1103_v16 }
 0x710   :  { %1106 = vmatpush3.bf16.msra.mxu1 %v1103_v16  ;;  %v644_v24 = vmul.f32 %v643_v21, %v636_v20  ;;  %1194 = vrcp.f32 %v428_v17 }
 0x711   :  { %v1189_v25 = vpop.eup %1188  ;;  %v653_v27 = vadd.f32 %v651_v22, %v645_v2 }
 0x712   :  { %v426_v5 = vpop.permute.xlu1 %425  ;;  %v652_v26 = vadd.f32 %v651_v22, %v644_v24  ;;  %v638_v1 = vmul.f32 %v1189_v25, %v1484_v45 }
 0x713   :  { %1196 = vrcp.f32 %v426_v5 }
 0x714   :  { %1047 = vmatprep.mubr.msk.f32.mxu1 %vm64_vm0, %v652_v26  ;;  %v646_v28 = vmul.f32 %v643_v21, %v638_v1 }
 0x715   :  { %v1191_v39 = vpop.eup %1190  ;;  %1048 = vmatmul.mubr.msk.f32.vlgmr.msra.gmra.mrb[8].mxu1 %vm64_vm0, %v653_v27  ;;  %v795_v27 = vsub.s32 7, %v1326_v42 }
 0x716   :  { %v430_v37 = vpop.permute.xlu1 %429  ;;  %v654_v40 = vadd.f32 %v651_v22, %v646_v28  ;;  %v639_v41 = vmul.f32 %v1191_v39, %v1490_v57 }
 0x717   :  { %1198 = vrcp.f32 %v430_v37  ;;  %v796_v28 = vrot.slane %v1329_v49, %v795_v27 }
 0x718   :  { %1050 = vmatprep.mubr.msk.f32.mxu1 %vm64_vm0, %v654_v40  ;;  %v647_v43 = vmul.f32 %v643_v21, %v639_v41 }
 0x719   :  { %v1193_v44 = vpop.eup %1192 }
 0x71a   :  { %v436_v48 = vmul.f32 %v1193_v44, %v1368_v46  ;;  %v655_v45 = vadd.f32 %v651_v22, %v647_v43  ;;  %v1195_v52 = vpop.eup %1194  ;;  %v51_v46 = vld [vmem:[#allocation4 + $0x40] sm:$0xff] }
 0x71b   :  { %v440_v59 = vmul.f32 %v1195_v52, %v1374_v50  ;;  %v1107_v63 = vpack.c.bf16 %v52_v62, %v51_v46  ;;  %v56_v50 = vld [vmem:[#allocation4 + $0x68] sm:$0xff] }
 0x71c   :  { %903 = vrot.lane.b32.xlu0 %v436_v48, %s1262_s7  ;;  %1051 = vmatmul.mubr.msk.f32.gmra.mrb[10].mxu1 %vm64_vm0, %v655_v45 }
 0x71d   :  { %v1197_v54 = vpop.eup %1196  ;;  %1108 = vmatprep.subr.bf16.mxu0 %v1107_v63 }
 0x71e   :  { %v438_v56 = vmul.f32 %v1197_v54, %v1370_v47  ;;  %1110 = vmatpush3.bf16.msra.mxu0 %v1107_v63  ;;  %v55_v47 = vld [vmem:[#allocation4 + $0x60] sm:$0xff] }
 0x71f   :  { %1112 = vmatprep.subr.bf16.mxu0 %v1111_v3  ;;  %v1115_v4 = vpack.c.bf16 %v56_v50, %v55_v47 }
 0x720   :  { %905 = vrot.lane.b32.xlu1 %v438_v56, %s1262_s7  ;;  %907 = vrot.lane.b32.xlu0 %v440_v59, %s1262_s7 }
 0x721   :  { %v1199_v57 = vpop.eup %1198 }
 0x722   :  { %v442_v61 = vmul.f32 %v1199_v57, %v1377_v51  ;;  %1114 = vmatpush3.bf16.msra.mxu0 %v1111_v3  ;;  %v1119_v51 = vpack.c.bf16 %v58_v12, %v57_v6 }
 0x723   :  { %1116 = vmatprep.subr.bf16.mxu0 %v1115_v4 }
 0x724   :  { %909 = vrot.lane.b32.xlu1 %v442_v61, %s1262_s7 }
 0x726   :  { %1118 = vmatpush3.bf16.msra.mxu0 %v1115_v4 }
 0x727   :  { %1120 = vmatprep.subr.bf16.mxu0 %v1119_v51 }
 0x72a   :  { %1122 = vmatpush3.bf16.msra.mxu0 %v1119_v51 }
 0x78e   :  { %v904_v45 = vpop.permute.xlu0 %903 }
 0x792   :  { %v906_v44 = vpop.permute.xlu1 %905  ;;  %v908_v62 = vpop.permute.xlu0 %907 }
 0x796   :  { %v910_v61 = vpop.permute.xlu1 %909 }
 0x7e8   :  { %v1049_v30 = vpop.f32.mrb[8].mxu1 }
 0x7e9   :  { %v760_v36 = vadd.f32 %v1049_v30, %v659_v34  ;;  %v754_v32 = vpop.f32.mrb[9].mxu1 }
 0x7ea   :  { %v755_v7 = vadd.f32 %v754_v32, %v659_v34 }
 0x7eb   :  { %v778_v29 = vmul.f32 0.70710677, %v760_v36  ;;  %v774_v16 = vmul.f32 0.5, %v760_v36 }
 0x7ec   :  { %v777_v14 = vmul.f32 0.70710677, %v755_v7  ;;  %v773_v10 = vmul.f32 0.5, %v755_v7 }
 0x7ed   :  { %1200 = verf.f32 %v778_v29 }
 0x7ee   :  { %1202 = verf.f32 %v777_v14 }
 0x7ef   :  { %v1052_v53 = vpop.f32.mrb[10].mxu1 }
 0x7f0   :  { %v770_v31 = vadd.f32 %v1052_v53, %v659_v34  ;;  %v764_v55 = vpop.f32.mrb[11].mxu1 }
 0x7f1   :  { %v765_v8 = vadd.f32 %v764_v55, %v659_v34 }
 0x7f2   :  { %v780_v19 = vmul.f32 0.70710677, %v770_v31  ;;  %v776_v5 = vmul.f32 0.5, %v770_v31 }
 0x7f3   :  { %v779_v21 = vmul.f32 0.70710677, %v765_v8  ;;  %v775_v24 = vmul.f32 0.5, %v765_v8 }
 0x7f4   :  { %1204 = verf.f32 %v780_v19 }
 0x7f5   :  { %1206 = verf.f32 %v779_v21 }
 0x7f7   :  { %v1201_v58 = vpop.eup %1200 }
 0x7f8   :  { %v1203_v60 = vpop.eup %1202  ;;  %v786_v9 = vadd.f32 1.0, %v1201_v58 }
 0x7f9   :  { %v785_v11 = vadd.f32 1.0, %v1203_v60 }
 0x7fa   :  { %v790_v18 = vmul.f32 %v786_v9, %v774_v16 }
 0x7fb   :  { %v789_v17 = vmul.f32 %v785_v11, %v773_v10 }
 0x7fd   :  { %1069 = vmatprep.mubr.msk.f32.mxu0 %vm797_vm2, %v789_v17 }
 0x7fe   :  { %v1205_v20 = vpop.eup %1204  ;;  %1070 = vmatmul.mubr.msk.f32.vlgmr.msra.gmra.mrb[4].mxu0 %vm797_vm2, %v790_v18 }
 0x7ff   :  { %v1207_v22 = vpop.eup %1206  ;;  %v788_v2 = vadd.f32 1.0, %v1205_v20 }
 0x800   :  { %v787_v25 = vadd.f32 1.0, %v1207_v22 }
 0x801   :  { %v792_v1 = vmul.f32 %v788_v2, %v776_v5 }
 0x802   :  { %v791_v26 = vmul.f32 %v787_v25, %v775_v24 }
 0x804   :  { %1072 = vmatprep.mubr.msk.f32.mxu0 %vm797_vm2, %v791_v26 }
 0x805   :  { %1073 = vmatmul.mubr.msk.f32.gmra.mrb[6].mxu0 %vm797_vm2, %v792_v1 }
 0x8d1   :  { %v1071_v39 = vpop.f32.mrb[4].mxu0 }
 0x8d2   :  { %v882_v37 = vadd.f32 %v1071_v39, %v796_v28  ;;  %v876_v40 = vpop.f32.mrb[5].mxu0 }
 0x8d3   :  { %v877_v41 = vadd.f32 %v876_v40, %v796_v28 }
 0x8d4   :  { %v896_v43 = vadd.f32 %v882_v37, %v1462_v13 }
 0x8d5   :  { %v895_v48 = vadd.f32 %v877_v41, %v1464_v15 }
 0x8d6   :  { %v916_v52 = vsel %vm64_vm0, %v896_v43, %v906_v44 }
 0x8d7   :  { %v920_v54 = vsel %vm797_vm2, %v916_v52, 0.0  ;;  %v915_v56 = vsel %vm64_vm0, %v895_v48, %v904_v45 }
 0x8d8   :  { %924 = vst [vmem:[%s1563_s2 + $0x8] sm:$0xff] %v920_v54  ;;  %v919_v42 = vsel %vm797_vm2, %v915_v56, 0.0  ;;  %v1074_v49 = vpop.f32.mrb[6].mxu0 }
 0x8d9   :  { %923 = vst [vmem:[%s1563_s2] sm:$0xff] %v919_v42  ;;  %v892_v13 = vadd.f32 %v1074_v49, %v796_v28  ;;  %v886_v15 = vpop.f32.mrb[7].mxu0 }
 0x8da   :  { %v887_v59 = vadd.f32 %v886_v15, %v796_v28 }
 0x8db   :  { %v898_v57 = vadd.f32 %v892_v13, %v1474_v0 }
 0x8dc   :  { %v897_v46 = vadd.f32 %v887_v59, %v1472_v23 }
 0x8dd   :  { %v918_v63 = vsel %vm64_vm0, %v898_v57, %v910_v61 }
 0x8de   :  { %v922_v35 = vsel %vm797_vm2, %v918_v63, 0.0  ;;  %v917_v38 = vsel %vm64_vm0, %v897_v46, %v908_v62 }
 0x8df   :  { %926 = vst [vmem:[%s1563_s2 + $0x18] sm:$0xff] %v922_v35  ;;  %v921_v3 = vsel %vm797_vm2, %v917_v38, 0.0 }
 0x8e0   :  { %925 = vst [vmem:[%s1563_s2 + $0x10] sm:$0xff] %v921_v3 }
 0x8e1   :  { %931 = vsyncpa [#allocation3], 1 }
 0x8e2   :  { %932 = vsyncpa [#allocation5], 1 }

</bundles_post_ra>
